<compile_context>
chip_gen: v7x
topology: tpu7x:2x2x1
jax: 0.10.0
libtpu: 0.0.40
codegen_flags: <defaults>
</compile_context>

<pallas_src>
import functools

import jax
import jax.numpy as jnp
from jax.experimental import pallas as pl
from jax.experimental.pallas import tpu as pltpu


def _round_up(x: int, m: int) -> int:
    return (x + m - 1) // m * m


# ---------------------------------------------------------------------------
# Kernel
# ---------------------------------------------------------------------------
def linear_kernel(x_ref, w_ref, b_ref, o_ref, acc_ref):
    """Computes one (tm, tn) output tile; grid axis 2 is the K (=In) reduction."""
    k = pl.program_id(2)

    # x block: (tm, tk); w block: (tk, tn) — canonical MXU layout, no transpose.
    partial = jax.lax.dot_general(
        x_ref[...], w_ref[...],
        dimension_numbers=(((1,), (0,)), ((), ())),
        preferred_element_type=jnp.float32,
    )

    @pl.when(k == 0)
    def _():
        # Fold the bias into the first K step: no zero-init pass over the
        # accumulator and no separate epilogue broadcast-add.
        acc_ref[...] = partial + b_ref[...]

    @pl.when(k > 0)
    def _():
        acc_ref[...] += partial

    @pl.when(k == pl.num_programs(2) - 1)
    def _():
        o_ref[...] = acc_ref[...].astype(o_ref.dtype)


# ---------------------------------------------------------------------------
# Parameter preparation (one-time, hoisted out of the forward)
# ---------------------------------------------------------------------------
def _param_tiles(in_features: int, out_features: int, tn: int, tk: int):
    """Validate/round N,K tile sizes; deterministic from the param shapes only."""
    tn = min(_round_up(max(tn, 128), 128), _round_up(out_features, 128))
    tk = min(_round_up(max(tk, 128), 128), _round_up(in_features, 128))
    out_p = _round_up(out_features, tn)
    # v7x megacore: if N would be a single block but can be split into two
    # lane-dense halves, split it so both TensorCores get independent work.
    if out_p // tn == 1 and out_p >= 256 and (out_p // 128) % 2 == 0:
        tn = out_p // 2
    return tn, tk


def prepare_params(weight, bias, *, tn=512, tk=1024, param_dtype=jnp.float32):
    """One-time: transpose weight to (In, Out), pad to tile multiples, cast.

    weight: (Out, In) PyTorch-layout; bias: (Out,).
    Returns (wT_padded (Inp, Outp), bias_padded (1, Outp), meta) where meta is a
    static tuple (out_features, tn, tk) consumed by linear_forward.
    """
    weight = jnp.asarray(weight)
    bias = jnp.asarray(bias)
    out_features, in_features = weight.shape
    tn, tk = _param_tiles(in_features, out_features, tn, tk)
    in_p = _round_up(in_features, tk)
    out_p = _round_up(out_features, tn)
    wT = jnp.pad(weight.T, ((0, in_p - in_features), (0, out_p - out_features)))
    wT = wT.astype(param_dtype)
    b = jnp.pad(bias, (0, out_p - out_features)).reshape(1, out_p)
    b = b.astype(jnp.float32)
    return wT, b, (int(out_features), int(tn), int(tk))


# ---------------------------------------------------------------------------
# Forward
# ---------------------------------------------------------------------------
@functools.partial(jax.jit, static_argnames=("meta", "tm"))
def linear_forward(x, wT_padded, b_padded, *, meta, tm=512):
    """y = x @ W^T + b, with W already prepared by prepare_params()."""
    out_features, tn, tk = meta
    B, in_features = x.shape
    in_p, out_p = wT_padded.shape
    x_dtype = wT_padded.dtype          # match param dtype on the MXU (f32 or bf16)
    itemsize = jnp.dtype(x_dtype).itemsize

    # bf16 packs 16 sublanes per vreg -> round the M tile to 16 in that case.
    sub = 16 if x_dtype == jnp.bfloat16 else 8
    tm = _round_up(max(min(max(tm, sub), _round_up(B, sub)), sub), sub)
    b_p = _round_up(B, tm)

    xp = x
    if (b_p, in_p) != (B, in_features):
        xp = jnp.pad(x, ((0, b_p - B), (0, in_p - in_features)))
    xp = xp.astype(x_dtype)

    grid = (b_p // tm, out_p // tn, in_p // tk)

    # Deeper pipelining on the streamed operands only for long K loops.
    pipe = dict(pipeline_mode=pl.Buffered(3)) if grid[2] >= 4 else {}
    n_bufs = 3 if grid[2] >= 4 else 2

    # Scoped-VMEM budget derived from the actual working set (+ headroom),
    # capped well inside v7x's 64 MiB physical VMEM.
    need = (n_bufs * tm * tk * itemsize          # x blocks
            + n_bufs * tk * tn * itemsize        # weight blocks
            + 2 * tn * 4                         # bias blocks
            + 2 * tm * tn * 4                    # output blocks
            + tm * tn * 4)                       # accumulator scratch
    vmem_limit = int(min(56 * 1024 * 1024, max(32 * 1024 * 1024, 2 * need)))

    out = pl.pallas_call(
        linear_kernel,
        out_shape=jax.ShapeDtypeStruct((b_p, out_p), jnp.float32),
        grid=grid,
        in_specs=[
            pl.BlockSpec((tm, tk), lambda i, j, k: (i, k), **pipe),   # x
            pl.BlockSpec((tk, tn), lambda i, j, k: (k, j), **pipe),   # W^T (In, Out)
            pl.BlockSpec((1, tn), lambda i, j, k: (0, j)),            # bias
        ],
        out_specs=pl.BlockSpec((tm, tn), lambda i, j, k: (i, j)),
        scratch_shapes=[pltpu.VMEM((tm, tn), jnp.float32)],
        compiler_params=pltpu.CompilerParams(
            dimension_semantics=("parallel", "parallel", "arbitrary"),
            vmem_limit_bytes=vmem_limit,
        ),
        cost_estimate=pl.CostEstimate(
            flops=2 * b_p * in_p * out_p,
            transcendentals=0,
            bytes_accessed=itemsize * (b_p * in_p + in_p * out_p)
                           + 4 * (out_p + b_p * out_p),
        ),
    )(xp, wT_padded, b_padded)

    if (b_p, out_p) != (B, out_features):
        out = out[:B, :out_features]
    return out


def mock_torch_module_forward(x, weight, bias, *, tm=512, tn=512, tk=1024,
                              param_dtype=jnp.float32):
    """Drop-in equivalent of MockTorchModule.forward(x) = Linear(In, Out)(x).

    Convenience path that pads the params per call. For repeated forward calls,
    use prepare_params() once and linear_forward() per call instead.
    """
    wT, b, meta = prepare_params(weight, bias, tn=tn, tk=tk,
                                 param_dtype=param_dtype)
    return linear_forward(x, wT, b, meta=meta, tm=tm)


# ---------------------------------------------------------------------------
# Self-test
# ---------------------------------------------------------------------------
if __name__ == "__main__":
    key = jax.random.PRNGKey(0)

    def make_case(k, B, In, Out):
        kx, kw, kb = jax.random.split(k, 3)
        x = jax.random.normal(kx, (B, In), dtype=jnp.float32)
        bound = 1.0 / jnp.sqrt(jnp.float32(In))
        w = jax.random.uniform(kw, (Out, In), minval=-bound, maxval=bound,
                               dtype=jnp.float32)
        b = jax.random.uniform(kb, (Out,), minval=-bound, maxval=bound,
                               dtype=jnp.float32)
        return x, w, b

    k1, k2 = jax.random.split(key)

    # Case 1: small shapes, Out=16 exercises lane padding (Out -> 128).
    x1, w1, b1 = make_case(k1, B=8, In=128, Out=16)
    out1 = jax.block_until_ready(mock_torch_module_forward(x1, w1, b1))
    ref1 = x1 @ w1.T + b1
    assert out1.shape == (8, 16)
    assert jnp.allclose(out1, ref1, atol=1e-5, rtol=1e-5)

    # Case 2: module defaults (784 -> 10) with params prepared once and the
    # forward called twice (hoisted-pad path), exercising ragged In/Out padding.
    x2, w2, b2 = make_case(k2, B=16, In=784, Out=10)
    wT2, bp2, meta2 = prepare_params(w2, b2)
    out2 = jax.block_until_ready(linear_forward(x2, wT2, bp2, meta=meta2))
    out2b = jax.block_until_ready(linear_forward(x2 * 2.0, wT2, bp2, meta=meta2))
    ref2 = x2 @ w2.T + b2
    ref2b = (x2 * 2.0) @ w2.T + b2
    assert out2.shape == (16, 10)
    assert jnp.allclose(out2, ref2, atol=1e-4, rtol=1e-4)
    assert jnp.allclose(out2b, ref2b, atol=1e-4, rtol=1e-4)

    # Case 3: bf16 params/activations with f32 accumulation (relaxed tolerance).
    wT3, bp3, meta3 = prepare_params(w2, b2, param_dtype=jnp.bfloat16)
    out3 = jax.block_until_ready(linear_forward(x2, wT3, bp3, meta=meta3))
    assert out3.shape == (16, 10)
    assert out3.dtype == jnp.float32
    assert jnp.allclose(out3, ref2, atol=2e-2, rtol=2e-2)

    print("KERNEL_OK")
</pallas_src>

<mosaic_0001>
module attributes {stable_mosaic.version = 11 : i64} {
  func.func @linear_kernel(%arg0: i32, %arg1: i32, %arg2: i32, %arg3: memref<8x128xf32, #tpu.memory_space<vmem>>, %arg4: memref<128x128xf32, #tpu.memory_space<vmem>>, %arg5: memref<1x128xf32, #tpu.memory_space<vmem>>, %arg6: memref<8x128xf32, #tpu.memory_space<vmem>>, %arg7: memref<8x128xf32, #tpu.memory_space<vmem>>) attributes {dimension_semantics = [#tpu.dimension_semantics<parallel>, #tpu.dimension_semantics<parallel>, #tpu.dimension_semantics<arbitrary>], iteration_bounds = array<i64: 1, 1, 1>, scalar_prefetch = 0 : i64, scratch_operands = 1 : i64, tpu.core_type = #tpu.core_type<tc>, window_params = [{transform_indices = @transform_0, window_bounds = array<i64: 8, 128>}, {transform_indices = @transform_1, window_bounds = array<i64: 128, 128>}, {transform_indices = @transform_2, window_bounds = array<i64: 1, 128>}, {transform_indices = @transform_3, window_bounds = array<i64: 8, 128>}]} {
    %c0 = arith.constant 0 : index
    %c0_0 = arith.constant 0 : index
    %0 = vector.load %arg3[%c0, %c0_0] : memref<8x128xf32, #tpu.memory_space<vmem>>, vector<8x128xf32>
    %c0_1 = arith.constant 0 : index
    %c0_2 = arith.constant 0 : index
    %1 = vector.load %arg4[%c0_1, %c0_2] : memref<128x128xf32, #tpu.memory_space<vmem>>, vector<128x128xf32>
    %cst = arith.constant dense<0.000000e+00> : vector<8x128xf32>
    %2 = tpu.matmul %0, %1, %cst {dimension_numbers = #tpu.dot_dimension_numbers<[1], [0], [0], [1], [0, 0, 1, 1], [], []>} : vector<8x128xf32>, vector<128x128xf32>, vector<8x128xf32> -> vector<8x128xf32>
    %c0_i32 = arith.constant 0 : i32
    %3 = arith.cmpi eq, %arg2, %c0_i32 : i32
    %4 = arith.extui %3 : i1 to i32
    %c0_i32_3 = arith.constant 0 : i32
    %5 = arith.cmpi ne, %4, %c0_i32_3 : i32
    scf.if %5 {
      %c0_8 = arith.constant 0 : index
      %c0_9 = arith.constant 0 : index
      %12 = vector.load %arg5[%c0_8, %c0_9] : memref<1x128xf32, #tpu.memory_space<vmem>>, vector<1x128xf32>
      %13 = vector.broadcast %12 : vector<1x128xf32> to vector<8x128xf32>
      %14 = arith.addf %2, %13 : vector<8x128xf32>
      %c0_10 = arith.constant 0 : index
      %c0_11 = arith.constant 0 : index
      %15 = vector.load %arg7[%c0_10, %c0_11] : memref<8x128xf32, #tpu.memory_space<vmem>>, vector<8x128xf32>
      tpu.vector_store %arg7[%c0_10, %c0_11], %14 {strides = array<i32>} : memref<8x128xf32, #tpu.memory_space<vmem>>, vector<8x128xf32>,
    } else {
    }
    %c0_i32_4 = arith.constant 0 : i32
    %6 = arith.cmpi sgt, %arg2, %c0_i32_4 : i32
    %7 = arith.extui %6 : i1 to i32
    %c0_i32_5 = arith.constant 0 : i32
    %8 = arith.cmpi ne, %7, %c0_i32_5 : i32
    scf.if %8 {
      %c0_8 = arith.constant 0 : index
      %c0_9 = arith.constant 0 : index
      %12 = vector.load %arg7[%c0_8, %c0_9] : memref<8x128xf32, #tpu.memory_space<vmem>>, vector<8x128xf32>
      %13 = arith.addf %12, %2 : vector<8x128xf32>
      %c0_10 = arith.constant 0 : index
      %c0_11 = arith.constant 0 : index
      %14 = vector.load %arg7[%c0_10, %c0_11] : memref<8x128xf32, #tpu.memory_space<vmem>>, vector<8x128xf32>
      tpu.vector_store %arg7[%c0_10, %c0_11], %13 {strides = array<i32>} : memref<8x128xf32, #tpu.memory_space<vmem>>, vector<8x128xf32>,
    } else {
    }
    %c0_i32_6 = arith.constant 0 : i32
    %9 = arith.cmpi eq, %arg2, %c0_i32_6 : i32
    %10 = arith.extui %9 : i1 to i32
    %c0_i32_7 = arith.constant 0 : i32
    %11 = arith.cmpi ne, %10, %c0_i32_7 : i32
    scf.if %11 {
      %c0_8 = arith.constant 0 : index
      %c0_9 = arith.constant 0 : index
      %12 = vector.load %arg7[%c0_8, %c0_9] : memref<8x128xf32, #tpu.memory_space<vmem>>, vector<8x128xf32>
      %c0_10 = arith.constant 0 : index
      %c0_11 = arith.constant 0 : index
      %13 = vector.load %arg6[%c0_10, %c0_11] : memref<8x128xf32, #tpu.memory_space<vmem>>, vector<8x128xf32>
      tpu.vector_store %arg6[%c0_10, %c0_11], %12 {strides = array<i32>} : memref<8x128xf32, #tpu.memory_space<vmem>>, vector<8x128xf32>,
    } else {
    }
    return
  }
  func.func @transform_0(%arg0: i32, %arg1: i32, %arg2: i32) -> (i32, i32) {
    %c0_i32 = arith.constant 0 : i32
    return %arg0, %arg2 : i32, i32
  }
  func.func @transform_1(%arg0: i32, %arg1: i32, %arg2: i32) -> (i32, i32) {
    %c0_i32 = arith.constant 0 : i32
    return %arg2, %arg1 : i32, i32
  }
  func.func @transform_2(%arg0: i32, %arg1: i32, %arg2: i32) -> (i32, i32) {
    %c0_i32 = arith.constant 0 : i32
    %c0_i32_0 = arith.constant 0 : i32
    return %c0_i32, %arg1 : i32, i32
  }
  func.func @transform_3(%arg0: i32, %arg1: i32, %arg2: i32) -> (i32, i32) {
    %c0_i32 = arith.constant 0 : i32
    return %arg0, %arg1 : i32, i32
  }
}

</mosaic_0001>

<bundles_post_ra>
// kernel: linear_forward.1
= control target key start
LH: loop header
LB: loop body
LE: loop exit
PB: predicated region body
PF: predicated region fallthrough
CT: control target
= control target key end

     0   :  { %8 = vsyncpa [#allocation4], 0  ;;  %s400_s0 = inlined_call_operand.hbm [shape: f32[8,128], index: 0, kind: input, shape index: {}]   ;;  %s401_s1 = inlined_call_operand.hbm [shape: f32[128,128], index: 1, kind: input, shape index: {}]   ;;  %s402_s2 = inlined_call_operand.vmem [shape: f32[1,128], index: 2, kind: input, shape index: {}]   ;;  %s403_s3 = inlined_call_operand.hbm [shape: f32[8,128], index: 3, kind: output, shape index: {}]  }
   0x1   :  { %9 = vsyncpa [#allocation7], 0 }
   0x2   :  { %10 = vsyncpa [#allocation5], 0  ;;  %s326_s12 = smov [#allocation3]   ;;  %s327_s14 = smov [#allocation6]  }
   0x3   :  { %s17_s13 = sshll.u32 %s326_s12, 4  ;;  %s26_s15 = sshll.u32 %s327_s14, 4  ;;  %s18_s13 = int_to_ptr.vmem [resolvable:$true] %s17_s13  ;;  %s354_s15 = int_to_ptr.vmem [resolvable:$true] %s26_s15 }
   0x4   :  { %s254_s18 = scalar_lea.hbm %s400_s0, 128 }
   0x5   :  { %p255_p0 = scmp.ne.s32.totalorder %s400_s0, %s254_s18  ;;  %p258_p1 = scmp.lt.u32.totalorder %s254_s18, %s400_s0 }
   0x7   :  { %p260_p2 = pnand %p258_p1, %p255_p0 }
   0x9   :  { %263 = shalt.err (!%p260_p2)
}
   0xa   :  { %s264_s23 = scalar_lea.vmem %s18_s13, 128  ;;  %p269_p4 = scmp.lt.s32.totalorder %s18_s13, %s18_s13 }
   0xb   :  { %p265_p3 = scmp.ne.s32.totalorder %s18_s13, %s264_s23  ;;  %p270_p5 = scmp.lt.s32.totalorder %s264_s23, %s264_s23 }
   0xd   :  { %p271_p6 = por %p270_p5, %p269_p4 }
   0xf   :  { %p272_p7 = pnand %p271_p6, %p265_p3 }
  0x11   :  { %275 = shalt.err (!%p272_p7)
}
  0x12   :  { %20 = dma.hbm_to_vmem [thread:$0]  %s400_s0, 128, %s18_s13, [#allocation4]  }
  0x13   :  { %s276_s28 = scalar_lea.hbm %s401_s1, 2048 }
  0x14   :  { %p277_p8 = scmp.ne.s32.totalorder %s401_s1, %s276_s28  ;;  %p280_p9 = scmp.lt.u32.totalorder %s276_s28, %s401_s1 }
  0x16   :  { %p282_p10 = pnand %p280_p9, %p277_p8 }
  0x18   :  { %285 = shalt.err (!%p282_p10)
}
  0x19   :  { %s286_s6 = scalar_lea.vmem %s354_s15, 2048  ;;  %p291_p12 = scmp.lt.s32.totalorder %s354_s15, %s354_s15 }
  0x1a   :  { %p287_p11 = scmp.ne.s32.totalorder %s354_s15, %s286_s6  ;;  %p292_p13 = scmp.lt.s32.totalorder %s286_s6, %s286_s6 }
  0x1c   :  { %p293_p0 = por %p292_p13, %p291_p12 }
  0x1e   :  { %p294_p1 = pnand %p293_p0, %p287_p11 }
  0x20   :  { %297 = shalt.err (!%p294_p1)
}
  0x21   :  { %s328_s0 = smov 128   ;;  %s329_s7 = smov 8  }
  0x22   :  { %32 = dma.hbm_to_vmem [thread:$0]  %s401_s1, 2048, %s354_s15, [#allocation7], %s328_s0, %s328_s0, %s329_s7  }
  0x23   :  { %320 = dma.done.wait [#allocation4], 128  }
  0x24   :  { %321 = vsyncadd [#allocation4], 4294967168 }
  0x25   :  { %322 = dma.done.wait [#allocation7], 2048  }
  0x26   :  { %323 = vsyncadd [#allocation7], 4294965248  ;;  %v330_v0 = vmov 0.0|0.0   ;;  %vm331_vm0 = vmmov 0   ;;  %v332_v1 = vmov 0.0   ;;  %v42_v2 = vld [vmem:[#allocation6] sm:$0xff] }
  0x27   :  { %222 = vmatprep.subr.bf16.mxu0 %v330_v0  ;;  %219 = vmatprep.mubr.msk.f32.mxu0 %vm331_vm0, %v332_v1  ;;  %v43_v3 = vld [vmem:[#allocation6 + $0x8] sm:$0xff]  ;;  %v44_v4 = vld [vmem:[#allocation6 + $0x10] sm:$0xff]  ;;  %v45_v6 = vld [vmem:[#allocation6 + $0x18] sm:$0xff]  ;;  %s333_s11 = smov [#allocation8]  }
  0x28   :  { %v223_v5 = vpack.c.bf16 %v43_v3, %v42_v2  ;;  %v226_v7 = vpack.c.bf16 %v45_v6, %v44_v4  ;;  %v46_v8 = vld [vmem:[#allocation6 + $0x20] sm:$0xff]  ;;  %v47_v9 = vld [vmem:[#allocation6 + $0x28] sm:$0xff]  ;;  %v48_v11 = vld [vmem:[#allocation6 + $0x30] sm:$0xff]  ;;  %s159_s12 = sshll.u32 %s333_s11, 4  ;;  %s160_s12 = int_to_ptr.vmem [resolvable:$true] %s159_s12 }
  0x29   :  { %v229_v10 = vpack.c.bf16 %v47_v9, %v46_v8  ;;  %v49_v12 = vld [vmem:[#allocation6 + $0x38] sm:$0xff]  ;;  %v50_v14 = vld [vmem:[#allocation6 + $0x40] sm:$0xff]  ;;  %v51_v15 = vld [vmem:[#allocation6 + $0x48] sm:$0xff]  ;;  %s298_s13 = scalar_lea.vmem %s160_s12, 128  ;;  %p303_p3 = scmp.lt.s32.totalorder %s160_s12, %s160_s12 }
  0x2a   :  { %224 = vmatpush3.bf16.msra.mxu0 %v223_v5  ;;  %v232_v13 = vpack.c.bf16 %v49_v12, %v48_v11  ;;  %v235_v16 = vpack.c.bf16 %v51_v15, %v50_v14  ;;  %v52_v17 = vld [vmem:[#allocation6 + $0x50] sm:$0xff]  ;;  %v53_v18 = vld [vmem:[#allocation6 + $0x58] sm:$0xff]  ;;  %v54_v20 = vld [vmem:[#allocation6 + $0x60] sm:$0xff]  ;;  %p299_p2 = scmp.ne.s32.totalorder %s160_s12, %s298_s13  ;;  %p304_p4 = scmp.lt.s32.totalorder %s298_s13, %s298_s13 }
  0x2b   :  { %225 = vmatprep.subr.bf16.mxu0 %v330_v0  ;;  %v238_v19 = vpack.c.bf16 %v53_v18, %v52_v17  ;;  %v55_v21 = vld [vmem:[#allocation6 + $0x68] sm:$0xff]  ;;  %v56_v23 = vld [vmem:[#allocation6 + $0x70] sm:$0xff]  ;;  %v57_v24 = vld [vmem:[#allocation6 + $0x78] sm:$0xff] }
  0x2c   :  { %v241_v22 = vpack.c.bf16 %v55_v21, %v54_v20  ;;  %v244_v25 = vpack.c.bf16 %v57_v24, %v56_v23  ;;  %v41_v26 = vld [vmem:[#allocation3] sm:$0xff]  ;;  %p305_p5 = por %p304_p4, %p303_p3 }
  0x2d   :  { %v169_v27 = vld [vmem:[%s402_s2] ss:$0 sm:$0xff] }
  0x2e   :  { %227 = vmatpush3.bf16.msra.mxu0 %v226_v7  ;;  %p306_p6 = pnand %p305_p5, %p299_p2 }
  0x2f   :  { %228 = vmatprep.subr.bf16.mxu0 %v330_v0 }
  0x32   :  { %230 = vmatpush3.bf16.msra.mxu0 %v229_v10 }
  0x33   :  { %231 = vmatprep.subr.bf16.mxu0 %v330_v0 }
  0x36   :  { %233 = vmatpush3.bf16.msra.mxu0 %v232_v13 }
  0x37   :  { %234 = vmatprep.subr.bf16.mxu0 %v330_v0 }
  0x3a   :  { %236 = vmatpush3.bf16.msra.mxu0 %v235_v16 }
  0x3b   :  { %237 = vmatprep.subr.bf16.mxu0 %v330_v0 }
  0x3e   :  { %239 = vmatpush3.bf16.msra.mxu0 %v238_v19 }
  0x3f   :  { %240 = vmatprep.subr.bf16.mxu0 %v330_v0 }
  0x42   :  { %242 = vmatpush3.bf16.msra.mxu0 %v241_v22 }
  0x43   :  { %243 = vmatprep.subr.bf16.mxu0 %v330_v0 }
  0x46   :  { %245 = vmatpush3.bf16.msra.mxu0 %v244_v25 }
  0x49   :  { %220 = vmatmul.mubr.f32.vlgmr.msra.gmra.mrb[0].mxu0 %v41_v26 }
 0x11c   :  { %v124_v28 = vpop.f32.mrb[0].mxu0 }
 0x11d   :  { %v139_v29 = vadd.f32 %v169_v27, %v124_v28  ;;  %v221_v30 = vpop.f32.mrb[1].mxu0 }
 0x11f   :  { %152 = vst [vmem:[#allocation8] sm:$0xff] %v139_v29 }
 0x120   :  { %309 = shalt.err (!%p306_p6)
}
 0x121   :  { %s310_s16 = scalar_lea.hbm %s403_s3, 128 }
 0x122   :  { %p311_p7 = scmp.ne.s32.totalorder %s403_s3, %s310_s16  ;;  %p314_p8 = scmp.lt.u32.totalorder %s310_s16, %s403_s3 }
 0x124   :  { %p316_p9 = pnand %p314_p8, %p311_p7 }
 0x126   :  { %319 = shalt.err (!%p316_p9)
}
 0x127   :  { %162 = dma.vmem_to_hbm [thread:$0]  %s160_s12, 128, %s403_s3, [#allocation5]  }
 0x128   :  { %324 = dma.done.wait [#allocation5], 128  }
 0x129   :  { %325 = vsyncadd [#allocation5], 4294967168 }
 0x12a   :  { %166 = vsyncpa [#allocation4], 1 }
 0x12b   :  { %167 = vsyncpa [#allocation7], 1 }
 0x12c   :  { %168 = vsyncpa [#allocation5], 1 }

</bundles_post_ra>
